<compile_context>
chip_gen: v7x
topology: tpu7x:2x2x1
jax: 0.10.0
libtpu: 0.0.40
codegen_flags: <defaults>
</compile_context>

<pallas_src>
import jax
import jax.numpy as jnp
from jax.experimental import pallas as pl
from jax.experimental.pallas import tpu as pltpu

_LANE = 128
_SUB = 8


# ----------------------------------------------------------------------------- #
# Kernel
# ----------------------------------------------------------------------------- #
def _rnn_kernel(x_ref, w1_ref, b1_ref, w2_ref, b2_ref, w3_ref, b3_ref,
                decay_ref, h0_ref, out_ref, y_sc, d_state, c_state):
    """One grid step: fused-batch MLP over a (bt, seq_chunk) tile, then the
    carried decay/cumsum recurrence over that chunk."""
    s_idx = pl.program_id(1)

    # Reset the recurrence state at the start of every batch tile's seq sweep.
    @pl.when(s_idx == 0)
    def _():
        d_state[...] = jnp.zeros_like(d_state)
        c_state[...] = jnp.zeros_like(c_state)

    bt, sc, din = x_ref.shape
    cp = out_ref.shape[-1]
    cdt = w1_ref.dtype  # MXU operand dtype (f32 by default, bf16 if requested)

    # ---- fused-batch MLP: one (bt*sc, K) x (K, N) MXU matmul per layer ----
    x = x_ref[...].reshape(bt * sc, din).astype(cdt)
    h = jnp.dot(x, w1_ref[...], preferred_element_type=jnp.float32) + b1_ref[...]
    h = jnp.maximum(h, 0.0)
    h = jnp.dot(h.astype(cdt), w2_ref[...], preferred_element_type=jnp.float32) + b2_ref[...]
    h = jnp.maximum(h, 0.0)
    y = jnp.dot(h.astype(cdt), w3_ref[...], preferred_element_type=jnp.float32) + b3_ref[...]
    y_sc[...] = y.reshape(bt, sc, cp)  # (bt, sc, cp) f32 scratch (sc multiple of 8)

    # ---- decay + cumsum as a linear recurrence (O(S*C); no (S,S,C) tensor) ----
    decay_b = jnp.broadcast_to(decay_ref[...], (bt, cp))      # hoisted broadcast
    hid8 = jnp.broadcast_to(h0_ref[...], (bt, _SUB, cp))      # hoisted broadcast

    n8 = sc // _SUB

    @pl.loop(0, n8)
    def _(k):
        off = pl.multiple_of(k * _SUB, _SUB)                  # aligned sublane start
        yk = y_sc[:, pl.ds(off, _SUB), :]                     # (bt, 8, cp)
        d = d_state[...]
        c = c_state[...]
        rows = []
        for t in range(_SUB):                                 # static 8-step unroll
            d = decay_b * d + yk[:, t, :]
            c = c + d
            rows.append(c[:, None, :])
        out_chunk = jnp.concatenate(rows, axis=1) + hid8      # (bt, 8, cp)
        out_ref[:, pl.ds(off, _SUB), :] = out_chunk.astype(out_ref.dtype)
        d_state[...] = d
        c_state[...] = c


# ----------------------------------------------------------------------------- #
# Wrapper / glue
# ----------------------------------------------------------------------------- #
def _round_up(n, m):
    return ((n + m - 1) // m) * m


def _pad_axis(a, axis, target):
    pad = target - a.shape[axis]
    if pad <= 0:
        return a
    widths = [(0, 0)] * a.ndim
    widths[axis] = (0, pad)
    return jnp.pad(a, widths)


def layer_parallel_rnn(x, params, decay, hidden, *, batch_tile=None, seq_chunk=None,
                       mxu_dtype=None):
    """x: (B, S, Din) f32; decay: (C,); hidden: (B, C). Returns (B, S, C) f32.

    mxu_dtype: set to jnp.bfloat16 on v6e/v7x to feed the MXU bf16 operands
    (f32 accumulation is kept); default None keeps everything f32.
    """
    B, S, Din = x.shape
    w1, b1, w2, b2, w3, b3 = params
    H = w1.shape[1]
    C = w3.shape[1]

    # --- lane-dense padding of feature dims (exact for Linear + ReLU) ---
    Din_p = _round_up(Din, _LANE)
    Hp = _round_up(H, _LANE)
    Cp = _round_up(C, _LANE)
    # --- seq padded to a sublane multiple; pad rows are after all real rows,
    #     so the causal recurrence never lets them touch real outputs. ---
    S_p = _round_up(S, _SUB)

    xp = _pad_axis(_pad_axis(x, 2, Din_p), 1, S_p)
    w1p = _pad_axis(_pad_axis(w1, 0, Din_p), 1, Hp)
    b1p = _pad_axis(b1, 1, Hp)
    w2p = _pad_axis(_pad_axis(w2, 0, Hp), 1, Hp)
    b2p = _pad_axis(b2, 1, Hp)
    w3p = _pad_axis(_pad_axis(w3, 0, Hp), 1, Cp)
    b3p = _pad_axis(b3, 1, Cp)
    decay_p = _pad_axis(decay.reshape(1, C).astype(jnp.float32), 1, Cp)   # (1, Cp)
    hid_p = _pad_axis(hidden.astype(jnp.float32), 1, Cp).reshape(B, 1, Cp)

    if mxu_dtype is not None:
        xp = xp.astype(mxu_dtype)
        w1p = w1p.astype(mxu_dtype)
        w2p = w2p.astype(mxu_dtype)
        w3p = w3p.astype(mxu_dtype)

    # --- seq chunk: largest multiple of 8 dividing S_p, capped at 512 rows ---
    if seq_chunk is None:
        seq_chunk = _SUB
        d = _SUB
        while d <= min(S_p, 512):
            if S_p % d == 0:
                seq_chunk = d
            d += _SUB
    assert S_p % seq_chunk == 0 and seq_chunk % _SUB == 0
    n_sc = S_p // seq_chunk

    # --- batch tile: largest divisor of B that keeps >= 2 grid steps on the
    #     parallel axis (v7x dual-TC) and a bounded per-block footprint ---
    if batch_tile is None:
        per_row = seq_chunk * max(Din_p, Cp) * 4
        batch_tile = 1
        for d in range(1, B + 1):
            if B % d != 0:
                continue
            if B > 1 and B // d < 2:
                continue
            if d * per_row > 4 * 1024 * 1024:
                continue
            batch_tile = d
    assert B % batch_tile == 0
    nb = B // batch_tile

    # --- explicit VMEM budget (double-buffered x/out + weights + scratch) ---
    wbytes = 4 if mxu_dtype is None else jnp.dtype(mxu_dtype).itemsize
    vmem_need = (
        2 * batch_tile * seq_chunk * (Din_p * wbytes + Cp * 4)       # x + out blocks
        + 2 * (Din_p * Hp + Hp * Hp + Hp * Cp + 3 * Hp) * wbytes     # weights/biases
        + batch_tile * seq_chunk * Cp * 4                            # y scratch
        + 4 * batch_tile * Cp * 4                                    # recurrence state
        + (2 << 20)                                                  # headroom
    )
    vmem_limit = int(min(max(int(vmem_need * 1.5), 16 * 1024 * 1024), 100 * 1024 * 1024))

    out_p = pl.pallas_call(
        _rnn_kernel,
        out_shape=jax.ShapeDtypeStruct((B, S_p, Cp), jnp.float32),
        grid_spec=pltpu.PrefetchScalarGridSpec(
            num_scalar_prefetch=0,
            grid=(nb, n_sc),
            in_specs=[
                pl.BlockSpec((batch_tile, seq_chunk, Din_p), lambda b, s: (b, s, 0)),  # x
                pl.BlockSpec((Din_p, Hp), lambda b, s: (0, 0)),                        # w1
                pl.BlockSpec((1, Hp), lambda b, s: (0, 0)),                            # b1
                pl.BlockSpec((Hp, Hp), lambda b, s: (0, 0)),                           # w2
                pl.BlockSpec((1, Hp), lambda b, s: (0, 0)),                            # b2
                pl.BlockSpec((Hp, Cp), lambda b, s: (0, 0)),                           # w3
                pl.BlockSpec((1, Cp), lambda b, s: (0, 0)),                            # b3
                pl.BlockSpec((1, Cp), lambda b, s: (0, 0)),                            # decay
                pl.BlockSpec((batch_tile, 1, Cp), lambda b, s: (b, 0, 0)),             # hidden
            ],
            out_specs=pl.BlockSpec((batch_tile, seq_chunk, Cp), lambda b, s: (b, s, 0)),
            scratch_shapes=[
                pltpu.VMEM((batch_tile, seq_chunk, Cp), jnp.float32),  # y (MLP output)
                pltpu.VMEM((batch_tile, Cp), jnp.float32),             # decayed state d
                pltpu.VMEM((batch_tile, Cp), jnp.float32),             # cumsum state  c
            ],
        ),
        compiler_params=pltpu.CompilerParams(
            dimension_semantics=("parallel", "arbitrary"),
            vmem_limit_bytes=vmem_limit,
        ),
    )(xp, w1p, b1p, w2p, b2p, w3p, b3p, decay_p, hid_p)

    # Strip seq/channel padding outside the kernel.  (A consumer could instead
    # take the padded (B, S_p, Cp) layout directly to avoid this extra pass.)
    return out_p[:, :S, :C]


# ----------------------------------------------------------------------------- #
# Pure-JAX reference mirroring the PyTorch forward (dropout=0.0 => identity)
# ----------------------------------------------------------------------------- #
def compute_decay_factor(seq_len, decay):
    """D[i, j, c] = decay[c]**(j - i) for j >= i, else 0."""
    i = jnp.arange(seq_len)
    diff = i[None, :] - i[:, None]                        # (S, S) = j - i
    mask = diff >= 0
    safe_exp = jnp.where(mask, diff, 0)
    pow_ = decay[None, None, :] ** safe_exp[:, :, None]   # (S, S, C)
    return jnp.where(mask[:, :, None], pow_, 0.0).astype(jnp.float32)


def reference_forward(x, params, D, hidden):
    w1, b1, w2, b2, w3, b3 = params
    h = jnp.maximum(x @ w1 + b1, 0.0)
    h = jnp.maximum(h @ w2 + b2, 0.0)
    y = h @ w3 + b3                                        # (B, S, C)
    decayed = jnp.einsum('bic,ijc->bjc', y, D)             # decay_output
    out = jnp.cumsum(decayed, axis=1)
    return out + hidden[:, None, :]


if __name__ == "__main__":
    # Small shapes consistent with the module. dim_output == dim_hidden so that
    # the `output + hidden.unsqueeze(1)` broadcast in the original module is valid.
    B, S, DIM_IN, DIM_HID, DIM_OUT = 2, 8, 16, 32, 32

    key = jax.random.PRNGKey(0)
    ks = jax.random.split(key, 9)

    # Deterministic parameter init (Linear weights stored as [in, out]).
    w1 = jax.random.normal(ks[0], (DIM_IN, DIM_HID), jnp.float32) * 0.1
    b1 = jax.random.normal(ks[1], (1, DIM_HID), jnp.float32) * 0.01
    w2 = jax.random.normal(ks[2], (DIM_HID, DIM_HID), jnp.float32) * 0.1
    b2 = jax.random.normal(ks[3], (1, DIM_HID), jnp.float32) * 0.01
    w3 = jax.random.normal(ks[4], (DIM_HID, DIM_OUT), jnp.float32) * 0.1
    b3 = jax.random.normal(ks[5], (1, DIM_OUT), jnp.float32) * 0.01
    params = (w1, b1, w2, b2, w3, b3)

    # Decay buffer (one factor per output channel).
    decay = jnp.linspace(0.5, 0.95, DIM_OUT).astype(jnp.float32)

    x = jax.random.normal(ks[6], (B, S, DIM_IN), jnp.float32)
    hidden = jax.random.normal(ks[7], (B, DIM_OUT), jnp.float32)

    out = layer_parallel_rnn(x, params, decay, hidden)
    out = jax.block_until_ready(out)

    D = compute_decay_factor(S, decay)                     # reference uses original D
    ref = reference_forward(x, params, D, hidden)
    assert out.shape == (B, S, DIM_OUT)
    assert jnp.allclose(out, ref, rtol=1e-4, atol=1e-4), "mismatch vs reference"

    # TODO(synk): nn.Dropout is identity at p=0.0 (inference); stochastic dropout
    # would need pltpu.prng_* and is intentionally not implemented.
    print("KERNEL_OK")
</pallas_src>

<mosaic_0001>
module attributes {stable_mosaic.version = 11 : i64} {
  func.func @_rnn_kernel(%arg0: i32, %arg1: i32, %arg2: memref<1x8x128xf32, #tpu.memory_space<vmem>>, %arg3: memref<128x128xf32, #tpu.memory_space<vmem>>, %arg4: memref<1x128xf32, #tpu.memory_space<vmem>>, %arg5: memref<128x128xf32, #tpu.memory_space<vmem>>, %arg6: memref<1x128xf32, #tpu.memory_space<vmem>>, %arg7: memref<128x128xf32, #tpu.memory_space<vmem>>, %arg8: memref<1x128xf32, #tpu.memory_space<vmem>>, %arg9: memref<1x128xf32, #tpu.memory_space<vmem>>, %arg10: memref<1x1x128xf32, #tpu.memory_space<vmem>>, %arg11: memref<1x8x128xf32, #tpu.memory_space<vmem>>, %arg12: memref<1x8x128xf32, #tpu.memory_space<vmem>>, %arg13: memref<1x128xf32, #tpu.memory_space<vmem>>, %arg14: memref<1x128xf32, #tpu.memory_space<vmem>>) attributes {dimension_semantics = [#tpu.dimension_semantics<parallel>, #tpu.dimension_semantics<arbitrary>], iteration_bounds = array<i64: 2, 1>, scalar_prefetch = 0 : i64, scratch_operands = 3 : i64, tpu.core_type = #tpu.core_type<tc>, window_params = [{transform_indices = @transform_0, window_bounds = array<i64: 1, 8, 128>}, {pipeline_mode = #tpu.pipeline_mode<synchronous>, transform_indices = @transform_1, window_bounds = array<i64: 128, 128>}, {pipeline_mode = #tpu.pipeline_mode<synchronous>, transform_indices = @transform_2, window_bounds = array<i64: 1, 128>}, {pipeline_mode = #tpu.pipeline_mode<synchronous>, transform_indices = @transform_3, window_bounds = array<i64: 128, 128>}, {pipeline_mode = #tpu.pipeline_mode<synchronous>, transform_indices = @transform_4, window_bounds = array<i64: 1, 128>}, {pipeline_mode = #tpu.pipeline_mode<synchronous>, transform_indices = @transform_5, window_bounds = array<i64: 128, 128>}, {pipeline_mode = #tpu.pipeline_mode<synchronous>, transform_indices = @transform_6, window_bounds = array<i64: 1, 128>}, {pipeline_mode = #tpu.pipeline_mode<synchronous>, transform_indices = @transform_7, window_bounds = array<i64: 1, 128>}, {transform_indices = @transform_8, window_bounds = array<i64: 1, 1, 128>}, {transform_indices = @transform_9, window_bounds = array<i64: 1, 8, 128>}]} {
    %c0_i32 = arith.constant 0 : i32
    %0 = arith.cmpi eq, %arg1, %c0_i32 : i32
    %1 = arith.extui %0 : i1 to i32
    %c0_i32_0 = arith.constant 0 : i32
    %2 = arith.cmpi ne, %1, %c0_i32_0 : i32
    scf.if %2 {
      %cst_42 = arith.constant 0.000000e+00 : f32
      %92 = vector.broadcast %cst_42 : f32 to vector<1x128xf32>
      %c0_43 = arith.constant 0 : index
      %c0_44 = arith.constant 0 : index
      %93 = vector.load %arg13[%c0_43, %c0_44] : memref<1x128xf32, #tpu.memory_space<vmem>>, vector<1x128xf32>
      tpu.vector_store %arg13[%c0_43, %c0_44], %92 {strides = array<i32>} : memref<1x128xf32, #tpu.memory_space<vmem>>, vector<1x128xf32>,
      %cst_45 = arith.constant 0.000000e+00 : f32
      %94 = vector.broadcast %cst_45 : f32 to vector<1x128xf32>
      %c0_46 = arith.constant 0 : index
      %c0_47 = arith.constant 0 : index
      %95 = vector.load %arg14[%c0_46, %c0_47] : memref<1x128xf32, #tpu.memory_space<vmem>>, vector<1x128xf32>
      tpu.vector_store %arg14[%c0_46, %c0_47], %94 {strides = array<i32>} : memref<1x128xf32, #tpu.memory_space<vmem>>, vector<1x128xf32>,
    } else {
    }
    %c0 = arith.constant 0 : index
    %c0_1 = arith.constant 0 : index
    %c0_2 = arith.constant 0 : index
    %3 = vector.load %arg2[%c0, %c0_1, %c0_2] : memref<1x8x128xf32, #tpu.memory_space<vmem>>, vector<1x8x128xf32>
    %4 = vector.shape_cast %3 : vector<1x8x128xf32> to vector<8x128xf32>
    %c0_3 = arith.constant 0 : index
    %c0_4 = arith.constant 0 : index
    %5 = vector.load %arg3[%c0_3, %c0_4] : memref<128x128xf32, #tpu.memory_space<vmem>>, vector<128x128xf32>
    %cst = arith.constant dense<0.000000e+00> : vector<8x128xf32>
    %6 = tpu.matmul %4, %5, %cst {dimension_numbers = #tpu.dot_dimension_numbers<[1], [0], [0], [1], [0, 0, 1, 1], [], []>} : vector<8x128xf32>, vector<128x128xf32>, vector<8x128xf32> -> vector<8x128xf32>
    %c0_5 = arith.constant 0 : index
    %c0_6 = arith.constant 0 : index
    %7 = vector.load %arg4[%c0_5, %c0_6] : memref<1x128xf32, #tpu.memory_space<vmem>>, vector<1x128xf32>
    %8 = vector.broadcast %7 : vector<1x128xf32> to vector<8x128xf32>
    %9 = arith.addf %6, %8 : vector<8x128xf32>
    %cst_7 = arith.constant 0.000000e+00 : f32
    %10 = vector.broadcast %cst_7 : f32 to vector<8x128xf32>
    %11 = arith.maximumf %9, %10 : vector<8x128xf32>
    %c0_8 = arith.constant 0 : index
    %c0_9 = arith.constant 0 : index
    %12 = vector.load %arg5[%c0_8, %c0_9] : memref<128x128xf32, #tpu.memory_space<vmem>>, vector<128x128xf32>
    %cst_10 = arith.constant dense<0.000000e+00> : vector<8x128xf32>
    %13 = tpu.matmul %11, %12, %cst_10 {dimension_numbers = #tpu.dot_dimension_numbers<[1], [0], [0], [1], [0, 0, 1, 1], [], []>} : vector<8x128xf32>, vector<128x128xf32>, vector<8x128xf32> -> vector<8x128xf32>
    %c0_11 = arith.constant 0 : index
    %c0_12 = arith.constant 0 : index
    %14 = vector.load %arg6[%c0_11, %c0_12] : memref<1x128xf32, #tpu.memory_space<vmem>>, vector<1x128xf32>
    %15 = vector.broadcast %14 : vector<1x128xf32> to vector<8x128xf32>
    %16 = arith.addf %13, %15 : vector<8x128xf32>
    %cst_13 = arith.constant 0.000000e+00 : f32
    %17 = vector.broadcast %cst_13 : f32 to vector<8x128xf32>
    %18 = arith.maximumf %16, %17 : vector<8x128xf32>
    %c0_14 = arith.constant 0 : index
    %c0_15 = arith.constant 0 : index
    %19 = vector.load %arg7[%c0_14, %c0_15] : memref<128x128xf32, #tpu.memory_space<vmem>>, vector<128x128xf32>
    %cst_16 = arith.constant dense<0.000000e+00> : vector<8x128xf32>
    %20 = tpu.matmul %18, %19, %cst_16 {dimension_numbers = #tpu.dot_dimension_numbers<[1], [0], [0], [1], [0, 0, 1, 1], [], []>} : vector<8x128xf32>, vector<128x128xf32>, vector<8x128xf32> -> vector<8x128xf32>
    %c0_17 = arith.constant 0 : index
    %c0_18 = arith.constant 0 : index
    %21 = vector.load %arg8[%c0_17, %c0_18] : memref<1x128xf32, #tpu.memory_space<vmem>>, vector<1x128xf32>
    %22 = vector.broadcast %21 : vector<1x128xf32> to vector<8x128xf32>
    %23 = arith.addf %20, %22 : vector<8x128xf32>
    %24 = vector.shape_cast %23 : vector<8x128xf32> to vector<1x8x128xf32>
    %c0_19 = arith.constant 0 : index
    %c0_20 = arith.constant 0 : index
    %c0_21 = arith.constant 0 : index
    %25 = vector.load %arg12[%c0_19, %c0_20, %c0_21] : memref<1x8x128xf32, #tpu.memory_space<vmem>>, vector<1x8x128xf32>
    tpu.vector_store %arg12[%c0_19, %c0_20, %c0_21], %24 {strides = array<i32>} : memref<1x8x128xf32, #tpu.memory_space<vmem>>, vector<1x8x128xf32>,
    %c0_22 = arith.constant 0 : index
    %c0_23 = arith.constant 0 : index
    %26 = vector.load %arg9[%c0_22, %c0_23] : memref<1x128xf32, #tpu.memory_space<vmem>>, vector<1x128xf32>
    %c0_24 = arith.constant 0 : index
    %c0_25 = arith.constant 0 : index
    %c0_26 = arith.constant 0 : index
    %27 = vector.load %arg10[%c0_24, %c0_25, %c0_26] : memref<1x1x128xf32, #tpu.memory_space<vmem>>, vector<1x1x128xf32>
    %28 = vector.shape_cast %27 : vector<1x1x128xf32> to vector<1x1x128xf32>
    %29 = vector.broadcast %28 : vector<1x1x128xf32> to vector<1x8x128xf32>
    %c0_i32_27 = arith.constant 0 : i32
    %c1_i32 = arith.constant 1 : i32
    %30 = arith.muli %c0_i32_27, %c1_i32 : i32
    %c0_i32_28 = arith.constant 0 : i32
    %31 = arith.addi %c0_i32_28, %30 : i32
    %c8_i32 = arith.constant 8 : i32
    %32 = arith.muli %31, %c8_i32 : i32
    %33 = tpu.assume_multiple %32, 8 : i32
    %c0_29 = arith.constant 0 : index
    %34 = arith.index_cast %33 : i32 to index
    %c0_30 = arith.constant 0 : index
    %35 = vector.load %arg12[%c0_29, %34, %c0_30] : memref<1x8x128xf32, #tpu.memory_space<vmem>>, vector<1x8x128xf32>
    %c0_31 = arith.constant 0 : index
    %c0_32 = arith.constant 0 : index
    %36 = vector.load %arg13[%c0_31, %c0_32] : memref<1x128xf32, #tpu.memory_space<vmem>>, vector<1x128xf32>
    %c0_33 = arith.constant 0 : index
    %c0_34 = arith.constant 0 : index
    %37 = vector.load %arg14[%c0_33, %c0_34] : memref<1x128xf32, #tpu.memory_space<vmem>>, vector<1x128xf32>
    %38 = arith.mulf %26, %36 : vector<1x128xf32>
    %39 = vector.extract_strided_slice %35 {offsets = [0, 0, 0], sizes = [1, 1, 128], strides = [1, 1, 1]} : vector<1x8x128xf32> to vector<1x1x128xf32>
    %40 = vector.shape_cast %39 : vector<1x1x128xf32> to vector<1x128xf32>
    %41 = arith.addf %38, %40 : vector<1x128xf32>
    %42 = arith.addf %37, %41 : vector<1x128xf32>
    %43 = vector.shape_cast %42 : vector<1x128xf32> to vector<1x1x128xf32>
    %44 = arith.mulf %26, %41 : vector<1x128xf32>
    %45 = vector.extract_strided_slice %35 {offsets = [0, 1, 0], sizes = [1, 1, 128], strides = [1, 1, 1]} : vector<1x8x128xf32> to vector<1x1x128xf32>
    %46 = vector.shape_cast %45 : vector<1x1x128xf32> to vector<1x128xf32>
    %47 = arith.addf %44, %46 : vector<1x128xf32>
    %48 = arith.addf %42, %47 : vector<1x128xf32>
    %49 = vector.shape_cast %48 : vector<1x128xf32> to vector<1x1x128xf32>
    %50 = arith.mulf %26, %47 : vector<1x128xf32>
    %51 = vector.extract_strided_slice %35 {offsets = [0, 2, 0], sizes = [1, 1, 128], strides = [1, 1, 1]} : vector<1x8x128xf32> to vector<1x1x128xf32>
    %52 = vector.shape_cast %51 : vector<1x1x128xf32> to vector<1x128xf32>
    %53 = arith.addf %50, %52 : vector<1x128xf32>
    %54 = arith.addf %48, %53 : vector<1x128xf32>
    %55 = vector.shape_cast %54 : vector<1x128xf32> to vector<1x1x128xf32>
    %56 = arith.mulf %26, %53 : vector<1x128xf32>
    %57 = vector.extract_strided_slice %35 {offsets = [0, 3, 0], sizes = [1, 1, 128], strides = [1, 1, 1]} : vector<1x8x128xf32> to vector<1x1x128xf32>
    %58 = vector.shape_cast %57 : vector<1x1x128xf32> to vector<1x128xf32>
    %59 = arith.addf %56, %58 : vector<1x128xf32>
    %60 = arith.addf %54, %59 : vector<1x128xf32>
    %61 = vector.shape_cast %60 : vector<1x128xf32> to vector<1x1x128xf32>
    %62 = arith.mulf %26, %59 : vector<1x128xf32>
    %63 = vector.extract_strided_slice %35 {offsets = [0, 4, 0], sizes = [1, 1, 128], strides = [1, 1, 1]} : vector<1x8x128xf32> to vector<1x1x128xf32>
    %64 = vector.shape_cast %63 : vector<1x1x128xf32> to vector<1x128xf32>
    %65 = arith.addf %62, %64 : vector<1x128xf32>
    %66 = arith.addf %60, %65 : vector<1x128xf32>
    %67 = vector.shape_cast %66 : vector<1x128xf32> to vector<1x1x128xf32>
    %68 = arith.mulf %26, %65 : vector<1x128xf32>
    %69 = vector.extract_strided_slice %35 {offsets = [0, 5, 0], sizes = [1, 1, 128], strides = [1, 1, 1]} : vector<1x8x128xf32> to vector<1x1x128xf32>
    %70 = vector.shape_cast %69 : vector<1x1x128xf32> to vector<1x128xf32>
    %71 = arith.addf %68, %70 : vector<1x128xf32>
    %72 = arith.addf %66, %71 : vector<1x128xf32>
    %73 = vector.shape_cast %72 : vector<1x128xf32> to vector<1x1x128xf32>
    %74 = arith.mulf %26, %71 : vector<1x128xf32>
    %75 = vector.extract_strided_slice %35 {offsets = [0, 6, 0], sizes = [1, 1, 128], strides = [1, 1, 1]} : vector<1x8x128xf32> to vector<1x1x128xf32>
    %76 = vector.shape_cast %75 : vector<1x1x128xf32> to vector<1x128xf32>
    %77 = arith.addf %74, %76 : vector<1x128xf32>
    %78 = arith.addf %72, %77 : vector<1x128xf32>
    %79 = vector.shape_cast %78 : vector<1x128xf32> to vector<1x1x128xf32>
    %80 = arith.mulf %26, %77 : vector<1x128xf32>
    %81 = vector.extract_strided_slice %35 {offsets = [0, 7, 0], sizes = [1, 1, 128], strides = [1, 1, 1]} : vector<1x8x128xf32> to vector<1x1x128xf32>
    %82 = vector.shape_cast %81 : vector<1x1x128xf32> to vector<1x128xf32>
    %83 = arith.addf %80, %82 : vector<1x128xf32>
    %84 = arith.addf %78, %83 : vector<1x128xf32>
    %85 = vector.shape_cast %84 : vector<1x128xf32> to vector<1x1x128xf32>
    %86 = tpu.concatenate %43, %49, %55, %61, %67, %73, %79, %85 in 1 : vector<1x1x128xf32>, vector<1x1x128xf32>, vector<1x1x128xf32>, vector<1x1x128xf32>, vector<1x1x128xf32>, vector<1x1x128xf32>, vector<1x1x128xf32>, vector<1x1x128xf32> -> vector<1x8x128xf32>
    %87 = arith.addf %86, %29 : vector<1x8x128xf32>
    %c0_35 = arith.constant 0 : index
    %88 = arith.index_cast %33 : i32 to index
    %c0_36 = arith.constant 0 : index
    %89 = vector.load %arg11[%c0_35, %88, %c0_36] : memref<1x8x128xf32, #tpu.memory_space<vmem>>, vector<1x8x128xf32>
    tpu.vector_store %arg11[%c0_35, %88, %c0_36], %87 {strides = array<i32>} : memref<1x8x128xf32, #tpu.memory_space<vmem>>, vector<1x8x128xf32>,
    %c0_37 = arith.constant 0 : index
    %c0_38 = arith.constant 0 : index
    %90 = vector.load %arg13[%c0_37, %c0_38] : memref<1x128xf32, #tpu.memory_space<vmem>>, vector<1x128xf32>
    tpu.vector_store %arg13[%c0_37, %c0_38], %83 {strides = array<i32>} : memref<1x128xf32, #tpu.memory_space<vmem>>, vector<1x128xf32>,
    %c0_39 = arith.constant 0 : index
    %c0_40 = arith.constant 0 : index
    %91 = vector.load %arg14[%c0_39, %c0_40] : memref<1x128xf32, #tpu.memory_space<vmem>>, vector<1x128xf32>
    tpu.vector_store %arg14[%c0_39, %c0_40], %84 {strides = array<i32>} : memref<1x128xf32, #tpu.memory_space<vmem>>, vector<1x128xf32>,
    %c1_i32_41 = arith.constant 1 : i32
    return
  }
  func.func @transform_0(%arg0: i32, %arg1: i32) -> (i32, i32, i32) {
    %c0_i32 = arith.constant 0 : i32
    %c0_i32_0 = arith.constant 0 : i32
    return %arg0, %arg1, %c0_i32 : i32, i32, i32
  }
  func.func @transform_1(%arg0: i32, %arg1: i32) -> (i32, i32) {
    %c0_i32 = arith.constant 0 : i32
    %c0_i32_0 = arith.constant 0 : i32
    %c0_i32_1 = arith.constant 0 : i32
    return %c0_i32, %c0_i32_0 : i32, i32
  }
  func.func @transform_2(%arg0: i32, %arg1: i32) -> (i32, i32) {
    %c0_i32 = arith.constant 0 : i32
    %c0_i32_0 = arith.constant 0 : i32
    %c0_i32_1 = arith.constant 0 : i32
    return %c0_i32, %c0_i32_0 : i32, i32
  }
  func.func @transform_3(%arg0: i32, %arg1: i32) -> (i32, i32) {
    %c0_i32 = arith.constant 0 : i32
    %c0_i32_0 = arith.constant 0 : i32
    %c0_i32_1 = arith.constant 0 : i32
    return %c0_i32, %c0_i32_0 : i32, i32
  }
  func.func @transform_4(%arg0: i32, %arg1: i32) -> (i32, i32) {
    %c0_i32 = arith.constant 0 : i32
    %c0_i32_0 = arith.constant 0 : i32
    %c0_i32_1 = arith.constant 0 : i32
    return %c0_i32, %c0_i32_0 : i32, i32
  }
  func.func @transform_5(%arg0: i32, %arg1: i32) -> (i32, i32) {
    %c0_i32 = arith.constant 0 : i32
    %c0_i32_0 = arith.constant 0 : i32
    %c0_i32_1 = arith.constant 0 : i32
    return %c0_i32, %c0_i32_0 : i32, i32
  }
  func.func @transform_6(%arg0: i32, %arg1: i32) -> (i32, i32) {
    %c0_i32 = arith.constant 0 : i32
    %c0_i32_0 = arith.constant 0 : i32
    %c0_i32_1 = arith.constant 0 : i32
    return %c0_i32, %c0_i32_0 : i32, i32
  }
  func.func @transform_7(%arg0: i32, %arg1: i32) -> (i32, i32) {
    %c0_i32 = arith.constant 0 : i32
    %c0_i32_0 = arith.constant 0 : i32
    %c0_i32_1 = arith.constant 0 : i32
    return %c0_i32, %c0_i32_0 : i32, i32
  }
  func.func @transform_8(%arg0: i32, %arg1: i32) -> (i32, i32, i32) {
    %c0_i32 = arith.constant 0 : i32
    %c0_i32_0 = arith.constant 0 : i32
    %c0_i32_1 = arith.constant 0 : i32
    return %arg0, %c0_i32, %c0_i32_0 : i32, i32, i32
  }
  func.func @transform_9(%arg0: i32, %arg1: i32) -> (i32, i32, i32) {
    %c0_i32 = arith.constant 0 : i32
    %c0_i32_0 = arith.constant 0 : i32
    return %arg0, %arg1, %c0_i32 : i32, i32, i32
  }
}

</mosaic_0001>

<bundles_post_ra>
// kernel: tpu_custom_call.1
= control target key start
LH: loop header
LB: loop body
LE: loop exit
PB: predicated region body
PF: predicated region fallthrough
CT: control target
= control target key end

     0   :  { %s1954_s0 = inlined_call_operand.hbm [shape: f32[2,8,128], index: 0, kind: input, shape index: {}]   ;;  %s1955_s1 = inlined_call_operand.hbm [shape: f32[128,128], index: 1, kind: input, shape index: {}]   ;;  %s1956_s2 = inlined_call_operand.vmem [shape: f32[1,128], index: 2, kind: input, shape index: {}]   ;;  %s1957_s3 = inlined_call_operand.hbm [shape: f32[128,128], index: 3, kind: input, shape index: {}]   ;;  %s1958_s4 = inlined_call_operand.vmem [shape: f32[1,128], index: 4, kind: input, shape index: {}]   ;;  %s1959_s5 = inlined_call_operand.hbm [shape: f32[128,128], index: 5, kind: input, shape index: {}]   ;;  %s1960_s6 = inlined_call_operand.vmem [shape: f32[1,128], index: 6, kind: input, shape index: {}]   ;;  %s1961_s7 = inlined_call_operand.vmem [shape: f32[1,128], index: 7, kind: input, shape index: {}]   ;;  %s1962_s8 = inlined_call_operand.vmem [shape: f32[2,1,128], index: 8, kind: input, shape index: {}]   ;;  %s1963_s9 = inlined_call_operand.hbm [shape: f32[2,8,128], index: 9, kind: output, shape index: {}]  }
   0x1   :  { %1972 = sst [smem:[#allocation21_spill]] %s1960_s6 }
   0x2   :  { %1973 = sst [smem:[#allocation22_spill]] %s1962_s8 }
   0x3   :  { %1974 = sst [smem:[#allocation23_spill]] %s1963_s9 }
   0x4   :  { %14 = vsyncpa [#allocation6], 0 }
   0x5   :  { %16 = vsyncpa [#allocation6 + $0x1], 0 }
   0x6   :  { %17 = vsyncpa [#allocation9], 0 }
   0x7   :  { %18 = vsyncpa [#allocation12], 0 }
   0x8   :  { %19 = vsyncpa [#allocation7], 0 }
   0x9   :  { %21 = vsyncpa [#allocation7 + $0x1], 0  ;;  %s1614_s30 = smov 0   ;;  %s1616_s10 = smov 0  }
   0xa   :  { %s1618_s11 = smov 0   ;;  %s1620_s12 = smov 0  }
   0xb   :  { %s1622_s13 = smov 0   ;;  %s1624_s14 = smov 0  }
   0xc LB: > { %1975 = sst [smem:[#allocation18_spill]] %s1531_s30  ;;  %s997_s15 = sadd.s32 4294967295, %s1551_s14   ;;  %s1551_s14 = sphi %s1624_s14, %s27_s14   ;;  %s1547_s13 = sphi %s1622_s13, %s2003_s13   ;;  %s1543_s12 = sphi %s1620_s12, %s2002_s12   ;;  %s1539_s11 = sphi %s1618_s11, %s2001_s11   ;;  %s1535_s10 = sphi %s1616_s10, %s2000_s10   ;;  %s1531_s30 = sphi %s1614_s30, %s1999_s30  }
   0xd   : > { %1976 = sst [smem:[#allocation19_spill]] %s1543_s12  ;;  %s998_s16 = sadd.s32 4294967294, %s1551_s14  }
   0xe   : > { %p61_p0 = scmp.ne.s32.totalorder %s1535_s10, %s1531_s30  ;;  %p1648_p1 = scmp.eq.s32.totalorder %s997_s15, 0 }
   0xf   : > { %p1652_p2 = scmp.eq.s32.totalorder %s997_s15, 1  ;;  %p266_p3 = scmp.eq.s32.totalorder %s998_s16, 1 }
  0x10   : > { %s1977_s17 = scalar_select %p1648_p1, 1, 0 }
  0x11   : > { %s1978_s18 = scalar_select %p1652_p2, 1, 0 }
  0x12   : > { %p1658_p4 = por %p1648_p1, %p61_p0  ;;  %p999_p5 = scmp.ge.s32.totalorder %s1551_s14, 1 }
  0x13   : > { %p1663_p6 = por %p266_p3, %p61_p0  ;;  %p273_p7 = scmp.lt.s32.totalorder %s1551_s14, 3 }
  0x14   : > { %s1979_s19 = scalar_select %p1658_p4, 1, 0 }
  0x15   : > { %s1980_s20 = scalar_select %p1663_p6, 1, 0 }
  0x16   : > { %p1668_p8 = pnand %p999_p5, %p273_p7  ;;  %s1553_s22 = smov [#allocation8]  }
  0x17   : > { %1981 = sst [smem:[#allocation20_spill]] %s1980_s20  ;;  %s285_s23 = sshll.u32 %s1553_s22, 4  ;;  %s1672_s23 = int_to_ptr.vmem [resolvable:$true] %s285_s23 }
  0x18   : > { %s1982_s21 = scalar_select %p1668_p8, 1, 0 }
  0x19   : > { %p1264_p9 = pneg %p1668_p8  ;;  %s1554_s25 = smov [#allocation10]  }
  0x1a   : > { %s301_s26 = sshll.u32 %s1554_s25, 4  ;;  %s1555_s27 = smov [#allocation11]   ;;  %s1683_s26 = int_to_ptr.vmem [resolvable:$true] %s301_s26 }
  0x1b   : > { %p1679_p11 = pnand %p1264_p9, %p1648_p1  ;;  %s1685_s28 = sshll.u32 %s1555_s27, 4  ;;  %s318_s28 = int_to_ptr.vmem [resolvable:$true] %s1685_s28 }
  0x1c   : > { %s1347_s16 = scalar_lea.hbm %s1955_s1, 2048 }
  0x1d   : > { %p1348_p12 = scmp.ne.s32.totalorder %s1955_s1, %s1347_s16  ;;  %p1695_p13 = pneg %p1679_p11 }
  0x1e   : > { %p1354_p5 = scmp.lt.u32.totalorder %s1347_s16, %s1955_s1 }
  0x1f   : > { %p1350_p0 = pnand %p1695_p13, %p1348_p12 }
  0x21   : > { %p1351_p3 = pneg %p1350_p0 }
  0x23   : > { %p1356_p7 = pnand %p1354_p5, %p1351_p3 }
  0x25   : > { %1359 = shalt.err (!%p1356_p7)
}
  0x26   : > { %s1360_s20 = scalar_lea.vmem %s1672_s23, 2048  ;;  %p1368_p1 = scmp.lt.s32.totalorder %s1672_s23, %s1672_s23 }
  0x27   : > { %p1361_p9 = scmp.ne.s32.totalorder %s1672_s23, %s1360_s20  ;;  %p1369_p4 = scmp.lt.s32.totalorder %s1360_s20, %s1360_s20 }
  0x29   : > { %p1363_p10 = pnand %p1361_p9, %p1695_p13  ;;  %p1370_p12 = por %p1369_p4, %p1368_p1 }
  0x2b   : > { %p1364_p6 = pneg %p1363_p10 }
  0x2d   : > { %p1371_p0 = pnand %p1370_p12, %p1364_p6 }
  0x2f   : > { %1374 = shalt.err (!%p1371_p0)
}
  0x30   : > { %s1556_s29 = smov 128   ;;  %s1557_s15 = smov 8  }
  0x31   : > { %1267 = dma.hbm_to_vmem [thread:$0]  (!%p1679_p11), %s1955_s1, 2048, %s1672_s23, [#allocation9], %s1556_s29, %s1556_s29, %s1557_s15  }
  0x32   : > { %s1375_s20 = scalar_lea.hbm %s1957_s3, 2048 }
  0x33   : > { %p1376_p1 = scmp.ne.s32.totalorder %s1957_s3, %s1375_s20  ;;  %p1382_p10 = scmp.lt.u32.totalorder %s1375_s20, %s1957_s3 }
  0x35   : > { %p1378_p4 = pnand %p1376_p1, %p1695_p13 }
  0x37   : > { %p1379_p6 = pneg %p1378_p4 }
  0x39   : > { %p1384_p3 = pnand %p1382_p10, %p1379_p6 }
  0x3b   : > { %1387 = shalt.err (!%p1384_p3)
}
  0x3c   : > { %s1388_s23 = scalar_lea.vmem %s1683_s26, 2048  ;;  %p1396_p12 = scmp.lt.s32.totalorder %s1683_s26, %s1683_s26 }
  0x3d   : > { %p1389_p5 = scmp.ne.s32.totalorder %s1683_s26, %s1388_s23  ;;  %p1397_p0 = scmp.lt.s32.totalorder %s1388_s23, %s1388_s23 }
  0x3f   : > { %p1391_p7 = pnand %p1389_p5, %p1695_p13  ;;  %p1398_p1 = por %p1397_p0, %p1396_p12 }
  0x41   : > { %p1392_p9 = pneg %p1391_p7 }
  0x43   : > { %p1399_p4 = pnand %p1398_p1, %p1392_p9 }
  0x45   : > { %1402 = shalt.err (!%p1399_p4)
}
  0x46   : > { %1270 = dma.hbm_to_vmem [thread:$0]  (!%p1679_p11), %s1957_s3, 2048, %s1683_s26, [#allocation9], %s1556_s29, %s1556_s29, %s1557_s15  }
  0x47   : > { %s1403_s16 = scalar_lea.hbm %s1959_s5, 2048 }
  0x48   : > { %p1404_p6 = scmp.ne.s32.totalorder %s1959_s5, %s1403_s16  ;;  %p1410_p5 = scmp.lt.u32.totalorder %s1403_s16, %s1959_s5 }
  0x4a   : > { %p1406_p10 = pnand %p1404_p6, %p1695_p13 }
  0x4c   : > { %p1407_p3 = pneg %p1406_p10 }
  0x4e   : > { %p1412_p7 = pnand %p1410_p5, %p1407_p3 }
  0x50   : > { %1415 = shalt.err (!%p1412_p7)
}
  0x51   : > { %s1416_s23 = scalar_lea.vmem %s318_s28, 2048  ;;  %p1424_p1 = scmp.lt.s32.totalorder %s318_s28, %s318_s28 }
  0x52   : > { %p1417_p9 = scmp.ne.s32.totalorder %s318_s28, %s1416_s23  ;;  %p1425_p4 = scmp.lt.s32.totalorder %s1416_s23, %s1416_s23 }
  0x54   : > { %p1419_p12 = pnand %p1417_p9, %p1695_p13  ;;  %p1426_p8 = por %p1425_p4, %p1424_p1 }
  0x56   : > { %p1420_p0 = pneg %p1419_p12 }
  0x58   : > { %p1427_p2 = pnand %p1426_p8, %p1420_p0 }
  0x5a   : > { %1430 = shalt.err (!%p1427_p2)
}
  0x5b   : > { %1273 = dma.hbm_to_vmem [thread:$0]  (!%p1679_p11), %s1959_s5, 2048, %s318_s28, [#allocation12], %s1556_s29, %s1556_s29, %s1557_s15  }
  0x5c   : > { %s48_s30 = sadd.s32 1, %s1539_s11  ;;  %s39_s24 = sadd.s32 1, %s1547_s13 }
  0x5d   : > { %p55_p2 = scmp.ne.s32.totalorder %s1539_s11, %s1535_s10  ;;  %p41_p8 = scmp.ge.s32.totalorder %s39_s24, 2 }
  0x5e   : > { %p56_p13 = scmp.eq.s32.totalorder %s1551_s14, 0  ;;  %p1985_p6 = scmp.ne.s32.totalorder %s1978_s18, 0 }
  0x5f   : > { %p1285_p3 = scmp.lt.s32.totalorder %s1551_s14, 2  ;;  %s2005_s24 = smov (%p41_p8, %s39_s24), 0 }
  0x60   : > { %p1774_p10 = por %p1985_p6, %p55_p2  ;;  %p57_p5 = por %p56_p13, %p55_p2 }
  0x61   : > { %s337_s9 = sand.u32 1, %s1539_s11   ;;  %s43_s12 = ssub.s32 %s1547_s13, %s2005_s24 }
  0x62   : > { %p46_p7 = scmp.eq.s32.totalorder %s43_s12, 0  ;;  %s1004_s28 = sshll.u32 %s337_s9, 3 }
  0x63   : > { %s1005_s29 = sshll.u32 %s1547_s13, 7  ;;  %s341_s25 = scalar_lea.vmem [#allocation5], %s1004_s28 }
  0x64   : > { %s1786_s15 = scalar_select %p46_p7, %s1539_s11, %s48_s30  }
  0x65   : > { %s1791_s18 = scalar_lea.hbm %s1954_s0, %s1005_s29  ;;  %s349_s27 = sshll.u32 %s341_s25, 4  ;;  %s1793_s27 = int_to_ptr.vmem [resolvable:$true] %s349_s27 }
  0x66   : > { %p1797_p11 = pnand %p1285_p3, %p57_p5  ;;  %s338_s23 = scalar_lea.sflag [#allocation6], %s337_s9 }
  0x67   : > { %s1431_s26 = scalar_lea.hbm %s1791_s18, 128  ;;  %s1436_s12 = scalar_lea.hbm %s1954_s0, 256 }
  0x68   : > { %p1432_p9 = scmp.ne.s32.totalorder %s1791_s18, %s1431_s26  ;;  %p1433_p12 = pneg %p1797_p11 }
  0x69   : > { %p1437_p4 = scmp.lt.u32.totalorder %s1791_s18, %s1954_s0  ;;  %p1438_p2 = scmp.lt.u32.totalorder %s1436_s12, %s1431_s26 }
  0x6a   : > { %p1434_p0 = pnand %p1433_p12, %p1432_p9  ;;  %p1440_p13 = scmp.lt.u32.totalorder %s1431_s26, %s1791_s18 }
  0x6b   : > { %p1439_p8 = por %p1438_p2, %p1437_p4 }
  0x6c   : > { %p1435_p1 = pneg %p1434_p0 }
  0x6d   : > { %p1441_p6 = por %p1440_p13, %p1439_p8 }
  0x6f   : > { %p1442_p3 = pnand %p1441_p6, %p1435_p1 }
  0x71   : > { %1445 = shalt.err (!%p1442_p3)
}
  0x72   : > { %s1446_s9 = scalar_lea.vmem %s1793_s27, 128  ;;  %s1558_s16 = smov [#allocation5]  }
  0x73   : > { %p1447_p5 = scmp.ne.s32.totalorder %s1793_s27, %s1446_s9  ;;  %s1451_s22 = sshll.u32 %s1558_s16, 4  ;;  %s1452_s22 = int_to_ptr.vmem [resolvable:$false] %s1451_s22 }
  0x74   : > { %s1453_s25 = scalar_lea.vmem %s1452_s22, 256  ;;  %p1454_p0 = scmp.lt.s32.totalorder %s1793_s27, %s1452_s22 }
  0x75   : > { %p1449_p7 = pnand %p1447_p5, %p1433_p12  ;;  %p1455_p4 = scmp.lt.s32.totalorder %s1453_s25, %s1446_s9 }
  0x77   : > { %p1450_p9 = pneg %p1449_p7  ;;  %p1456_p2 = por %p1455_p4, %p1454_p0 }
  0x79   : > { %p1457_p8 = pnand %p1456_p2, %p1450_p9 }
  0x7b   : > { %1460 = shalt.err (!%p1457_p8)
}
  0x7c   : > { %1277 = dma.hbm_to_vmem [thread:$0]  (!%p1797_p11), %s1791_s18, 128, %s1793_s27, %s338_s23  }
  0x7d   : > { %p1988_p1 = scmp.ne.s32.totalorder %s1982_s21, 0 }
  0x7e   : > { %s1829_s26 = sand.u32 (!%p1988_p1), 1, %s1535_s10   ;;  %p1989_p12 = scmp.ne.s32.totalorder (!%p1988_p1), %s1979_s19, 0 }
  0x7f   : > { %364 = sbr.rel (%p1988_p1) target bundleno = 874 (0x36a), region = 56  ;;  %s1007_s6 = sshll.u32 (!%p1988_p1), %s1829_s26, 3 }
  0x80   : > { %s367_s30 = scalar_lea.sflag (!%p1988_p1), [#allocation6], %s1829_s26  ;;  %s1835_s12 = scalar_lea.vmem (!%p1988_p1), [#allocation5], %s1007_s6 }
  0x86   : > { %1514 = dma.done.wait (%p1989_p12), %s367_s30, 128  }
  0x87   : > { %1516 = vsyncadd (%p1989_p12), %s367_s30, 4294967168  ;;  %p1990_p11 = scmp.ne.s32.totalorder %s1977_s17, 0 }
  0x89   : > { %1518 = dma.done.wait (%p1990_p11), [#allocation9], 4096  }
  0x8a   : > { %1520 = vsyncadd (%p1990_p11), [#allocation9], 4294963200 }
  0x8b   : > { %1522 = dma.done.wait (%p1990_p11), [#allocation12], 2048  }
  0x8c   : > { %1524 = vsyncadd (%p1990_p11), [#allocation12], 4294965248  ;;  %v1559_v0 = vmov 0.0|0.0   ;;  %v1560_v1 = vmov 0.0   ;;  %vm1561_vm0 = vmmov 0   ;;  %v430_v2 = vld [vmem:[#allocation8] sm:$0xff] }
  0x8d   : > { %1176 = vmatprep.subr.bf16.mxu0 %v1559_v0  ;;  %427 = vst [vmem:[#allocation3] sm:$0x1] %v1560_v1  ;;  %428 = vst [vmem:[#allocation4] sm:$0x1] %v1560_v1  ;;  %1103 = vmatprep.mubr.msk.f32.mxu0 %vm1561_vm0, %v1560_v1  ;;  %v431_v3 = vld [vmem:[#allocation8 + $0x8] sm:$0xff]  ;;  %v432_v4 = vld [vmem:[#allocation8 + $0x10] sm:$0xff] }
  0x8e   : > { %1200 = vmatprep.subr.bf16.mxu1 %v1559_v0  ;;  %1138 = vmatprep.mubr.msk.f32.mxu1 %vm1561_vm0, %v1560_v1  ;;  %v1177_v5 = vpack.c.bf16 %v431_v3, %v430_v2  ;;  %v433_v6 = vld [vmem:[#allocation8 + $0x18] sm:$0xff]  ;;  %v434_v8 = vld [vmem:[#allocation8 + $0x20] sm:$0xff]  ;;  %v435_v9 = vld [vmem:[#allocation8 + $0x28] sm:$0xff]  ;;  %s1991_s29 = sld [smem:[#allocation21_spill]]  ;;  %s1992_s9 = sld [smem:[#allocation19_spill]]  ;;  %vm846_vm1 = vcmask 1040384  }
  0x8f   : > { %v1180_v7 = vpack.c.bf16 %v433_v6, %v432_v4  ;;  %v524_v10 = vld [vmem:[#allocation10] sm:$0xff]  ;;  %v525_v11 = vld [vmem:[#allocation10 + $0x8] sm:$0xff]  ;;  %v526_v12 = vld [vmem:[#allocation10 + $0x10] sm:$0xff]  ;;  %v1183_v14 = vpack.c.bf16 %v435_v9, %v434_v8  ;;  %vm848_vm2 = vcmask 1041408   ;;  %vm850_vm3 = vcmask 1042432   ;;  %s1993_s30 = sld [smem:[#allocation22_spill]] }
  0x90   : > { %1178 = vmatpush3.bf16.msra.mxu0 %v1177_v5  ;;  %v527_v13 = vld [vmem:[#allocation10 + $0x18] sm:$0xff]  ;;  %v1201_v15 = vpack.c.bf16 %v525_v11, %v524_v10  ;;  %v436_v16 = vld [vmem:[#allocation8 + $0x30] sm:$0xff]  ;;  %v528_v19 = vld [vmem:[#allocation10 + $0x20] sm:$0xff]  ;;  %vm852_vm4 = vcmask 1043456   ;;  %vm854_vm5 = vcmask 1044480   ;;  %vm856_vm6 = vcmask 1045504  }
  0x91   : > { %1179 = vmatprep.subr.bf16.mxu0 %v1559_v0  ;;  %v437_v17 = vld [vmem:[#allocation8 + $0x38] sm:$0xff]  ;;  %v1204_v18 = vpack.c.bf16 %v527_v13, %v526_v12  ;;  %v529_v20 = vld [vmem:[#allocation10 + $0x28] sm:$0xff]  ;;  %v438_v22 = vld [vmem:[#allocation8 + $0x40] sm:$0xff]  ;;  %vm858_vm7 = vcmask 1046528   ;;  %s419_s19 = scalar_lea.vmem [#allocation13], %s1007_s6  ;;  %s1994_s20 = sld [smem:[#allocation23_spill]] }
  0x92   : > { %1202 = vmatpush3.bf16.msra.mxu1 %v1201_v15  ;;  %v1186_v21 = vpack.c.bf16 %v437_v17, %v436_v16  ;;  %v439_v23 = vld [vmem:[#allocation8 + $0x48] sm:$0xff]  ;;  %v1207_v24 = vpack.c.bf16 %v529_v20, %v528_v19  ;;  %v530_v25 = vld [vmem:[#allocation10 + $0x30] sm:$0xff]  ;;  %v531_v26 = vld [vmem:[#allocation10 + $0x38] sm:$0xff]  ;;  %s879_s21 = sshll.u32 %s419_s19, 4  ;;  %s865_s28 = scalar_lea.sflag [#allocation7], %s1829_s26  ;;  %s1907_s21 = int_to_ptr.vmem [resolvable:$true] %s879_s21 }
  0x93   : > { %1203 = vmatprep.subr.bf16.mxu1 %v1559_v0  ;;  %v1189_v27 = vpack.c.bf16 %v439_v23, %v438_v22  ;;  %v440_v28 = vld [vmem:[#allocation8 + $0x50] sm:$0xff]  ;;  %v441_v29 = vld [vmem:[#allocation8 + $0x58] sm:$0xff]  ;;  %v1210_v30 = vpack.c.bf16 %v531_v26, %v530_v25  ;;  %v532_v31 = vld [vmem:[#allocation10 + $0x40] sm:$0xff]  ;;  %v731_v23 = vlaneseq  ;;  %s1563_s6 = smov [#allocation13]  }
  0x94   : > { %1181 = vmatpush3.bf16.msra.mxu0 %v1180_v7  ;;  %v533_v32 = vld [vmem:[#allocation10 + $0x48] sm:$0xff]  ;;  %v1192_v33 = vpack.c.bf16 %v441_v29, %v440_v28  ;;  %v442_v34 = vld [vmem:[#allocation8 + $0x60] sm:$0xff]  ;;  %v534_v37 = vld [vmem:[#allocation10 + $0x50] sm:$0xff]  ;;  %p420_p13 = scmp.lt.s32.totalorder %s1992_s9, 1  ;;  %s1017_s17 = sshll.u32 %s1992_s9, 7 }
  0x95   : > { %1182 = vmatprep.subr.bf16.mxu0 %v1559_v0  ;;  %v443_v35 = vld [vmem:[#allocation8 + $0x68] sm:$0xff]  ;;  %v1213_v36 = vpack.c.bf16 %v533_v32, %v532_v31  ;;  %v535_v38 = vld [vmem:[#allocation10 + $0x58] sm:$0xff]  ;;  %v444_v40 = vld [vmem:[#allocation8 + $0x70] sm:$0xff]  ;;  %v732_v25 = vshrl.u32 %v731_v23, 7 }
  0x96   : > { %1205 = vmatpush3.bf16.msra.mxu1 %v1204_v18  ;;  %v1195_v39 = vpack.c.bf16 %v443_v35, %v442_v34  ;;  %v445_v41 = vld [vmem:[#allocation8 + $0x78] sm:$0xff]  ;;  %v1216_v42 = vpack.c.bf16 %v535_v38, %v534_v37  ;;  %v536_v43 = vld [vmem:[#allocation10 + $0x60] sm:$0xff]  ;;  %v537_v44 = vld [vmem:[#allocation10 + $0x68] sm:$0xff]  ;;  %s421_s16 = scalar_select %p420_p13, %s1992_s9, 1 }
  0x97   : > { %1206 = vmatprep.subr.bf16.mxu1 %v1559_v0  ;;  %v1198_v45 = vpack.c.bf16 %v445_v41, %v444_v40  ;;  %v1219_v46 = vpack.c.bf16 %v537_v44, %v536_v43  ;;  %v429_v47 = vld [vmem:[%s1835_s12] sm:$0xff]  ;;  %v618_v51 = vld [vmem:[#allocation11] sm:$0xff]  ;;  %v619_v52 = vld [vmem:[#allocation11 + $0x8] sm:$0xff]  ;;  %s1905_s23 = scalar_lea.hbm %s1994_s20, %s1017_s17  ;;  %s1465_s9 = sshll.u32 %s1563_s6, 4  ;;  %s1466_s9 = int_to_ptr.vmem [resolvable:$false] %s1465_s9 }
  0x98   : > { %1184 = vmatpush3.bf16.msra.mxu0 %v1183_v14  ;;  %v538_v48 = vld [vmem:[#allocation10 + $0x70] sm:$0xff]  ;;  %v539_v49 = vld [vmem:[#allocation10 + $0x78] sm:$0xff]  ;;  %v1225_v54 = vpack.c.bf16 %v619_v52, %v618_v51  ;;  %v622_v57 = vld [vmem:[#allocation11 + $0x20] sm:$0xff]  ;;  %s422_s12 = scalar_lea.vmem %s1993_s30, %s421_s16  ;;  %s1467_s16 = scalar_lea.vmem %s1466_s9, 256 }
  0x99   : > { %1185 = vmatprep.subr.bf16.mxu0 %v1559_v0  ;;  %v1222_v50 = vpack.c.bf16 %v539_v49, %v538_v48  ;;  %v620_v53 = vld [vmem:[#allocation11 + $0x10] sm:$0xff]  ;;  %v621_v55 = vld [vmem:[#allocation11 + $0x18] sm:$0xff]  ;;  %v623_v58 = vld [vmem:[#allocation11 + $0x28] sm:$0xff]  ;;  %p1468_p7 = scmp.lt.s32.totalorder %s1907_s21, %s1466_s9 }
  0x9a   : > { %1208 = vmatpush3.bf16.msra.mxu1 %v1207_v24  ;;  %v1228_v56 = vpack.c.bf16 %v621_v55, %v620_v53  ;;  %v1231_v59 = vpack.c.bf16 %v623_v58, %v622_v57  ;;  %v624_v60 = vld [vmem:[#allocation11 + $0x30] sm:$0xff]  ;;  %v625_v61 = vld [vmem:[#allocation11 + $0x38] sm:$0xff]  ;;  %v626_v63 = vld [vmem:[#allocation11 + $0x40] sm:$0xff] }
  0x9b   : > { %1209 = vmatprep.subr.bf16.mxu1 %v1559_v0  ;;  %v1234_v62 = vpack.c.bf16 %v625_v61, %v624_v60  ;;  %v628_v3 = vld [vmem:[#allocation11 + $0x50] sm:$0xff]  ;;  %v629_v4 = vld [vmem:[#allocation11 + $0x58] sm:$0xff]  ;;  %v630_v6 = vld [vmem:[#allocation11 + $0x60] sm:$0xff]  ;;  %v807_v61 = vsub.s32 0, %v732_v25 }
  0x9c   : > { %1187 = vmatpush3.bf16.msra.mxu0 %v1186_v21  ;;  %v1240_v5 = vpack.c.bf16 %v629_v4, %v628_v3  ;;  %v631_v7 = vld [vmem:[#allocation11 + $0x68] sm:$0xff]  ;;  %v632_v14 = vld [vmem:[#allocation11 + $0x70] sm:$0xff]  ;;  %v633_v15 = vld [vmem:[#allocation11 + $0x78] sm:$0xff]  ;;  %v1562_v21 = vmov 1966171168  }
  0x9d   : > { %1188 = vmatprep.subr.bf16.mxu0 %v1559_v0  ;;  %v1243_v8 = vpack.c.bf16 %v631_v7, %v630_v6  ;;  %v1012_v9 = vld [vmem:[%s1956_s2] ss:$0 sm:$0xff]  ;;  %v1246_v16 = vpack.c.bf16 %v633_v15, %v632_v14  ;;  %v729_v22 = vunpack.c.l.s4 %v1562_v21  ;;  %v722_v48 = vld [vmem:[#allocation4] sm:$0x1] }
  0x9e   : > { %1211 = vmatpush3.bf16.msra.mxu1 %v1210_v30  ;;  %v1013_v17 = vld [vmem:[%s1958_s4] ss:$0 sm:$0xff] }
  0x9f   : > { %1212 = vmatprep.subr.bf16.mxu1 %v1559_v0  ;;  %v730_v24 = vunpack.c.0.s8 %v729_v22  ;;  %v712_v26 = vld [vmem:[%s1961_s7] sm:$0x1] }
  0xa0   : > { %1190 = vmatpush3.bf16.msra.mxu0 %v1189_v27  ;;  %v721_v27 = vld [vmem:[#allocation3] sm:$0x1] }
  0xa1   : > { %1191 = vmatprep.subr.bf16.mxu0 %v1559_v0  ;;  %v1014_v28 = vld [vmem:[%s1991_s29] ss:$0 sm:$0xff]  ;;  %v723_v29 = vmul.f32 %v721_v27, %v712_v26  ;;  %v733_v30 = vsub.s32 %v730_v24, %v732_v25  ;;  %s1461_s29 = scalar_lea.vmem %s1907_s21, 128 }
  0xa2   : > { %1214 = vmatpush3.bf16.msra.mxu1 %v1213_v36  ;;  %p1462_p6 = scmp.ne.s32.totalorder %s1907_s21, %s1461_s29  ;;  %p1469_p9 = scmp.lt.s32.totalorder %s1467_s16, %s1461_s29 }
  0xa3   : > { %1215 = vmatprep.subr.bf16.mxu1 %v1559_v0 }
  0xa4   : > { %1193 = vmatpush3.bf16.msra.mxu0 %v1192_v33  ;;  %p1463_p3 = pnand %p1462_p6, %p1774_p10  ;;  %p1470_p0 = por %p1469_p9, %p1468_p7 }
  0xa5   : > { %1194 = vmatprep.subr.bf16.mxu0 %v1559_v0 }
  0xa6   : > { %1217 = vmatpush3.bf16.msra.mxu1 %v1216_v42  ;;  %p1464_p5 = pneg %p1463_p3 }
  0xa7   : > { %1218 = vmatprep.subr.bf16.mxu1 %v1559_v0 }
  0xa8   : > { %1196 = vmatpush3.bf16.msra.mxu0 %v1195_v39  ;;  %p1471_p4 = pnand %p1470_p0, %p1464_p5 }
  0xa9   : > { %1197 = vmatprep.subr.bf16.mxu0 %v1559_v0 }
  0xaa   : > { %1220 = vmatpush3.bf16.msra.mxu1 %v1219_v46 }
  0xab   : > { %1221 = vmatprep.subr.bf16.mxu1 %v1559_v0 }
  0xac   : > { %1199 = vmatpush3.bf16.msra.mxu0 %v1198_v45 }
  0xad   : > { %1224 = vmatprep.subr.bf16.mxu0 %v1559_v0 }
  0xae   : > { %1223 = vmatpush3.bf16.msra.mxu1 %v1222_v50 }
  0xaf   : > { %1104 = vmatmul.mubr.f32.vlgmr.msra.gmra.mrb[0].mxu0 %v429_v47 }
  0xb0   : > { %1173 = vmatprep.mubr.msk.f32.mxu0 %vm1561_vm0, %v1560_v1  ;;  %1226 = vmatpush3.bf16.msra.mxu0 %v1225_v54  ;;  %v627_v1 = vld [vmem:[#allocation11 + $0x48] sm:$0xff] }
  0xb1   : > { %1227 = vmatprep.subr.bf16.mxu0 %v1559_v0  ;;  %v1237_v2 = vpack.c.bf16 %v627_v1, %v626_v63 }
  0xb4   : > { %1229 = vmatpush3.bf16.msra.mxu0 %v1228_v56 }
  0xb5   : > { %1230 = vmatprep.subr.bf16.mxu0 %v1559_v0 }
  0xb8   : > { %1232 = vmatpush3.bf16.msra.mxu0 %v1231_v59 }
  0xb9   : > { %1233 = vmatprep.subr.bf16.mxu0 %v1559_v0 }
  0xbc   : > { %1235 = vmatpush3.bf16.msra.mxu0 %v1234_v62 }
  0xbd   : > { %1236 = vmatprep.subr.bf16.mxu0 %v1559_v0 }
  0xc0   : > { %1238 = vmatpush3.bf16.msra.mxu0 %v1237_v2 }
  0xc1   : > { %1239 = vmatprep.subr.bf16.mxu0 %v1559_v0 }
  0xc4   : > { %1241 = vmatpush3.bf16.msra.mxu0 %v1240_v5 }
  0xc5   : > { %1242 = vmatprep.subr.bf16.mxu0 %v1559_v0 }
  0xc8   : > { %1244 = vmatpush3.bf16.msra.mxu0 %v1243_v8 }
  0xc9   : > { %1245 = vmatprep.subr.bf16.mxu0 %v1559_v0 }
  0xcc   : > { %1247 = vmatpush3.bf16.msra.mxu0 %v1246_v16 }
 0x182   : > { %v519_v10 = vpop.f32.mrb[0].mxu0 }
 0x183   : > { %v520_v11 = vadd.f32 %v1012_v9, %v519_v10  ;;  %v1105_v12 = vpop.f32.mrb[1].mxu0 }
 0x185   : > { %v523_v13 = vmax.f32 %v520_v11, 0.0 }
 0x187   : > { %1139 = vmatmul.mubr.f32.vlgmr.msra.gmra.mrb[0].mxu1 %v523_v13 }
 0x25a   : > { %v613_v18 = vpop.f32.mrb[0].mxu1 }
 0x25b   : > { %v614_v19 = vadd.f32 %v1013_v17, %v613_v18  ;;  %v1140_v0 = vpop.f32.mrb[1].mxu1 }
 0x25d   : > { %v617_v20 = vmax.f32 %v614_v19, 0.0  ;;  %v1015_v19 = vld [vmem:[%s422_s12] ss:$0 sm:$0xff] }
 0x25f   : > { %1174 = vmatmul.mubr.f32.vlgmr.msra.gmra.mrb[2].mxu0 %v617_v20 }
 0x332   : > { %v707_v31 = vpop.f32.mrb[2].mxu0 }
 0x333   : > { %v708_v32 = vadd.f32 %v1014_v28, %v707_v31  ;;  %v1175_v33 = vpop.f32.mrb[3].mxu0 }
 0x335   : > { %v724_v34 = vadd.f32 %v723_v29, %v708_v32  ;;  %v734_v35 = vrot.slane %v708_v32, %v733_v30  ;;  %v764_v43 = vcombine.high %v708_v32, %v708_v32 }
 0x337   : > { %v735_v36 = vcombine.high %v734_v35, %v734_v35  ;;  %v726_v37 = vmul.f32 %v724_v34, %v712_v26  ;;  %v742_v38 = vrot.slane %v734_v35, %v733_v30  ;;  %v771_v47 = vrot.slane %v764_v43, %v733_v30 }
 0x338   : > { %v725_v50 = vadd.f32 %v724_v34, %v722_v48 }
 0x339   : > { %v749_v39 = vrot.slane %v735_v36, %v733_v30  ;;  %v754_v42 = vcombine.high %v742_v38, %v742_v38  ;;  %v778_v52 = vrot.slane %v771_v47, %v733_v30  ;;  %v783_v53 = vcombine.high %v771_v47, %v771_v47 }
 0x33b   : > { %v751_v40 = vadd.f32 %v749_v39, %v726_v37  ;;  %v759_v46 = vcombine.high %v749_v39, %v749_v39  ;;  %v790_v58 = vrot.slane %v783_v53, %v733_v30  ;;  %v795_v1 = vcombine.high %v778_v52, %v778_v52 }
 0x33d   : > { %v753_v41 = vmul.f32 %v751_v40, %v712_v26  ;;  %v752_v54 = vadd.f32 %v751_v40, %v725_v50  ;;  %v800_v8 = vcombine.high %v790_v58, %v790_v58 }
 0x33f   : > { %v756_v44 = vadd.f32 %v754_v42, %v753_v41  ;;  %v808_v4 = vrot.slane %v752_v54, %v807_v61 }
 0x341   : > { %v758_v45 = vmul.f32 %v756_v44, %v712_v26  ;;  %v757_v56 = vadd.f32 %v756_v44, %v752_v54  ;;  %v847_v13 = vsel %vm846_vm1, %v725_v50, %v808_v4 }
 0x343   : > { %v761_v49 = vadd.f32 %v759_v46, %v758_v45  ;;  %v814_v5 = vrot.slane %v757_v56, %v807_v61 }
 0x345   : > { %v763_v51 = vmul.f32 %v761_v49, %v712_v26  ;;  %v762_v59 = vadd.f32 %v761_v49, %v757_v56  ;;  %v849_v15 = vsel %vm848_vm2, %v847_v13, %v814_v5 }
 0x347   : > { %v780_v55 = vadd.f32 %v778_v52, %v763_v51  ;;  %v820_v9 = vrot.slane %v762_v59, %v807_v61 }
 0x349   : > { %v782_v57 = vmul.f32 %v780_v55, %v712_v26  ;;  %v781_v62 = vadd.f32 %v780_v55, %v762_v59  ;;  %v851_v17 = vsel %vm850_vm3, %v849_v15, %v820_v9 }
 0x34b   : > { %v792_v60 = vadd.f32 %v790_v58, %v782_v57  ;;  %v826_v10 = vrot.slane %v781_v62, %v807_v61 }
 0x34d   : > { %v794_v63 = vmul.f32 %v792_v60, %v712_v26  ;;  %v793_v2 = vadd.f32 %v792_v60, %v781_v62  ;;  %v853_v18 = vsel %vm852_vm4, %v851_v17, %v826_v10 }
 0x34f   : > { %v797_v3 = vadd.f32 %v795_v1, %v794_v63  ;;  %v832_v12 = vrot.slane %v793_v2, %v807_v61 }
 0x351   : > { %v798_v6 = vadd.f32 %v797_v3, %v793_v2  ;;  %v799_v7 = vmul.f32 %v797_v3, %v712_v26  ;;  %v855_v20 = vsel %vm854_vm5, %v853_v18, %v832_v12 }
 0x353   : > { %v802_v11 = vadd.f32 %v800_v8, %v799_v7  ;;  %v838_v14 = vrot.slane %v798_v6, %v807_v61 }
 0x355   : > { %v803_v16 = vadd.f32 %v802_v11, %v798_v6  ;;  %862 = vst [vmem:[#allocation3] sm:$0x1] %v802_v11  ;;  %v857_v21 = vsel %vm856_vm6, %v855_v20, %v838_v14 }
 0x357   : > { %863 = vst [vmem:[#allocation4] sm:$0x1] %v803_v16  ;;  %v844_v0 = vrot.slane %v803_v16, %v807_v61 }
 0x359   : > { %v859_v22 = vsel %vm858_vm7, %v857_v21, %v844_v0 }
 0x35a   : > { %v860_v23 = vadd.f32 %v1015_v19, %v859_v22 }
 0x35c   : > { %861 = vst [vmem:[%s419_s19] sm:$0xff] %v860_v23 }
 0x35d   : > { %1474 = shalt.err (!%p1471_p4)
}
 0x35e   : > { %s1475_s26 = scalar_lea.hbm %s1905_s23, 128  ;;  %s1479_s30 = scalar_lea.hbm %s1994_s20, 256 }
 0x35f   : > { %p1476_p2 = scmp.ne.s32.totalorder %s1905_s23, %s1475_s26  ;;  %p1480_p12 = scmp.lt.u32.totalorder %s1905_s23, %s1994_s20 }
 0x360   : > { %p1481_p11 = scmp.lt.u32.totalorder %s1479_s30, %s1475_s26  ;;  %p1483_p6 = scmp.lt.u32.totalorder %s1475_s26, %s1905_s23 }
 0x361   : > { %p1477_p8 = pnand %p1476_p2, %p1774_p10 }
 0x362   : > { %p1482_p13 = por %p1481_p11, %p1480_p12 }
 0x363   : > { %p1478_p1 = pneg %p1477_p8 }
 0x364   : > { %p1484_p3 = por %p1483_p6, %p1482_p13 }
 0x366   : > { %p1485_p5 = pnand %p1484_p3, %p1478_p1 }
 0x368   : > { %1488 = shalt.err (!%p1485_p5)
}
 0x369   : > { %1262 = dma.vmem_to_hbm [thread:$0]  (%p1774_p10), %s1907_s21, 128, %s1905_s23, %s865_s28  }
 0x36a PF: > { %s1995_s19 = sld [smem:[#allocation18_spill]]  ;;  %s1996_s18 = sld [smem:[#allocation20_spill]] }
 0x36b   : > { %p1998_p9 = scmp.ge.s32.totalorder %s1551_s14, 2 }
 0x370   : > { %s891_s27 = sand.u32 1, %s1995_s19   ;;  %p1997_p7 = scmp.ne.s32.totalorder %s1996_s18, 0 }
 0x371   : > { %s892_s29 = scalar_lea.sflag [#allocation7], %s891_s27 }
 0x372   : > { %p1279_p0 = pnand %p1998_p9, %p1997_p7 }
 0x374   : > { %1526 = dma.done.wait (!%p1279_p0), %s892_s29, 128  }
 0x375   : > { %1528 = vsyncadd (!%p1279_p0), %s892_s29, 4294967168  ;;  %s27_s14 = sadd.s32 1, %s1551_s14   ;;  %s1999_s30 = smov %s1535_s10 }
 0x376   : > { %p24_p4 = scmp.ge.s32.totalorder %s27_s14, 4   ;;  %s2000_s10 = smov %s1539_s11 }
 0x377   : > { %s2001_s11 = smov %s1786_s15  ;;  %s2002_s12 = smov %s1547_s13 }
 0x378   : > { %s2003_s13 = smov %s2005_s24  ;;  %26 = sbr.rel (!%p24_p4) target bundleno = 12 (0xc), region = 120 }
 0x37f   :  { %897 = vsyncpa [#allocation6], 1 }
 0x380   :  { %899 = vsyncpa [#allocation6 + $0x1], 1 }
 0x381   :  { %900 = vsyncpa [#allocation9], 1 }
 0x382   :  { %901 = vsyncpa [#allocation12], 1 }
 0x383   :  { %902 = vsyncpa [#allocation7], 1 }
 0x384   :  { %904 = vsyncpa [#allocation7 + $0x1], 1 }

</bundles_post_ra>
